<compile_context>
chip_gen: v7x
topology: tpu7x:2x2x1
jax: 0.10.0
libtpu: 0.0.40
codegen_flags: <defaults>
</compile_context>

<pallas_src>
import jax
import jax.numpy as jnp
from jax.experimental import pallas as pl
from jax.experimental.pallas import tpu as pltpu


def _mlp_kernel(x_ref, w1_ref, b1_ref, w2_ref, b2_ref, w3_ref, b3_ref, o_ref):
    # Batch lives on the 128-lane axis (last dim); features on sublanes.
    x = x_ref[...]                                                  # (13, TB)

    # dense1: (10,13) @ (13,TB) -> (10,TB); bias broadcast along lanes.
    h1 = jnp.dot(w1_ref[...], x, preferred_element_type=jnp.float32) + b1_ref[...]
    h1 = jnp.maximum(h1, 0.0)                                       # ReLU

    # dense2: (15,10) @ (10,TB) -> (15,TB)
    h2 = jnp.dot(w2_ref[...], h1, preferred_element_type=jnp.float32) + b2_ref[...]
    h2 = jnp.maximum(h2, 0.0)                                       # ReLU

    # dense3 (15 -> 1) on VPU/XLU: multiply by the (15,1) weight column and
    # reduce over sublanes instead of an N=1 MXU dot.
    y = jnp.sum(h2 * w3_ref[...], axis=0, keepdims=True) + b3_ref[...]  # (1, TB)

    o_ref[...] = y.astype(o_ref.dtype)


def _round_up(x, m):
    return ((x + m - 1) // m) * m


def mlp_forward(x, params, *, tb=512):
    """x: (B, 13) f32.  params: weights in torch (out, in) layout except w3
    which is a pre-transposed (15, 1) column; biases as (out, 1) columns."""
    B = x.shape[0]
    w1, b1 = params["w1"], params["b1"]        # (10, 13), (10, 1)
    w2, b2 = params["w2"], params["b2"]        # (15, 10), (15, 1)
    w3, b3 = params["w3"], params["b3"]        # (15, 1),  (1, 1)

    # Lane-major batch layout: (features, batch); pad batch to a tile multiple.
    x_t = x.T                                                       # (13, B)
    tb = max(128, _round_up(tb, 128))
    tb = min(tb, _round_up(B, 128))
    pad_b = _round_up(B, tb)
    if pad_b != B:
        x_t = jnp.pad(x_t, ((0, 0), (0, pad_b - B)))
    grid = (pad_b // tb,)

    # Weights/biases: full blocks with constant index_maps -> resident in VMEM,
    # no per-grid-step re-DMA.
    const = lambda shape: pl.BlockSpec(shape, lambda i: (0, 0))

    flops = 2 * pad_b * (13 * 10 + 10 * 15 + 15 * 1)
    bytes_accessed = (pad_b * (13 + 1) * 4
                      + 4 * (10 * 13 + 10 + 15 * 10 + 15 + 15 + 1))

    out_t = pl.pallas_call(
        _mlp_kernel,
        out_shape=jax.ShapeDtypeStruct((1, pad_b), jnp.float32),
        grid=grid,
        in_specs=[
            pl.BlockSpec((13, tb), lambda i: (0, i)),               # x, pipelined
            const(w1.shape), const(b1.shape),
            const(w2.shape), const(b2.shape),
            const(w3.shape), const(b3.shape),
        ],
        out_specs=pl.BlockSpec((1, tb), lambda i: (0, i)),          # lane-dense
        compiler_params=pltpu.CompilerParams(
            dimension_semantics=("parallel",),                      # 2 TCs on v7x
        ),
        cost_estimate=pl.CostEstimate(
            flops=flops, transcendentals=0, bytes_accessed=bytes_accessed),
    )(x_t, w1, b1, w2, b2, w3, b3)

    return out_t[:, :B].T                                           # (B, 1)


def init_params(key):
    """Deterministic init mimicking torch.nn.Linear (uniform +/- 1/sqrt(fan_in)).
    Weights in torch (out, in) layout; w3 pre-transposed to (15, 1)."""
    dims = [(13, 10), (10, 15), (15, 1)]
    params = {}
    keys = jax.random.split(key, 2 * len(dims))
    for idx, (fan_in, fan_out) in enumerate(dims):
        bound = 1.0 / jnp.sqrt(float(fan_in))
        w = jax.random.uniform(keys[2 * idx], (fan_out, fan_in),
                               jnp.float32, -bound, bound)
        b = jax.random.uniform(keys[2 * idx + 1], (fan_out, 1),
                               jnp.float32, -bound, bound)
        params[f"w{idx + 1}"] = w
        params[f"b{idx + 1}"] = b
    params["w3"] = params["w3"].T                # (1,15) -> (15,1) column
    return params


def reference_forward(x, params):
    h = jnp.maximum(x @ params["w1"].T + params["b1"].T, 0.0)
    h = jnp.maximum(h @ params["w2"].T + params["b2"].T, 0.0)
    return h @ params["w3"] + params["b3"].T


if __name__ == "__main__":
    key = jax.random.PRNGKey(0)
    k_x, k_p = jax.random.split(key)

    B = 8
    x = jax.random.normal(k_x, (B, 13), dtype=jnp.float32)
    params = init_params(k_p)

    out = jax.block_until_ready(mlp_forward(x, params))
    ref = reference_forward(x, params)

    assert out.shape == (B, 1)
    assert jnp.allclose(out, ref, atol=1e-5, rtol=1e-5), "mismatch vs reference"

    print("KERNEL_OK")
</pallas_src>

<mosaic_0001>
module attributes {stable_mosaic.version = 11 : i64} {
  func.func @_mlp_kernel(%arg0: i32, %arg1: memref<13x128xf32, #tpu.memory_space<vmem>>, %arg2: memref<10x13xf32, #tpu.memory_space<vmem>>, %arg3: memref<10x1xf32, #tpu.memory_space<vmem>>, %arg4: memref<15x10xf32, #tpu.memory_space<vmem>>, %arg5: memref<15x1xf32, #tpu.memory_space<vmem>>, %arg6: memref<15x1xf32, #tpu.memory_space<vmem>>, %arg7: memref<1x1xf32, #tpu.memory_space<vmem>>, %arg8: memref<1x128xf32, #tpu.memory_space<vmem>>) attributes {dimension_semantics = [#tpu.dimension_semantics<parallel>], iteration_bounds = array<i64: 1>, scalar_prefetch = 0 : i64, scratch_operands = 0 : i64, tpu.core_type = #tpu.core_type<tc>, window_params = [{transform_indices = @transform_0, window_bounds = array<i64: 13, 128>}, {pipeline_mode = #tpu.pipeline_mode<synchronous>, transform_indices = @transform_1, window_bounds = array<i64: 10, 13>}, {pipeline_mode = #tpu.pipeline_mode<synchronous>, transform_indices = @transform_2, window_bounds = array<i64: 10, 1>}, {pipeline_mode = #tpu.pipeline_mode<synchronous>, transform_indices = @transform_3, window_bounds = array<i64: 15, 10>}, {pipeline_mode = #tpu.pipeline_mode<synchronous>, transform_indices = @transform_4, window_bounds = array<i64: 15, 1>}, {pipeline_mode = #tpu.pipeline_mode<synchronous>, transform_indices = @transform_5, window_bounds = array<i64: 15, 1>}, {pipeline_mode = #tpu.pipeline_mode<synchronous>, transform_indices = @transform_6, window_bounds = array<i64: 1, 1>}, {transform_indices = @transform_7, window_bounds = array<i64: 1, 128>}]} {
    %c0 = arith.constant 0 : index
    %c0_0 = arith.constant 0 : index
    %0 = vector.load %arg1[%c0, %c0_0] : memref<13x128xf32, #tpu.memory_space<vmem>>, vector<13x128xf32>
    %c0_1 = arith.constant 0 : index
    %c0_2 = arith.constant 0 : index
    %1 = vector.load %arg2[%c0_1, %c0_2] : memref<10x13xf32, #tpu.memory_space<vmem>>, vector<10x13xf32>
    %cst = arith.constant dense<0.000000e+00> : vector<10x128xf32>
    %2 = tpu.matmul %1, %0, %cst {dimension_numbers = #tpu.dot_dimension_numbers<[1], [0], [0], [1], [0, 0, 1, 1], [], []>} : vector<10x13xf32>, vector<13x128xf32>, vector<10x128xf32> -> vector<10x128xf32>
    %c0_3 = arith.constant 0 : index
    %c0_4 = arith.constant 0 : index
    %3 = vector.load %arg3[%c0_3, %c0_4] : memref<10x1xf32, #tpu.memory_space<vmem>>, vector<10x1xf32>
    %4 = vector.broadcast %3 : vector<10x1xf32> to vector<10x128xf32>
    %5 = arith.addf %2, %4 : vector<10x128xf32>
    %cst_5 = arith.constant 0.000000e+00 : f32
    %6 = vector.broadcast %cst_5 : f32 to vector<10x128xf32>
    %7 = arith.maximumf %5, %6 : vector<10x128xf32>
    %c0_6 = arith.constant 0 : index
    %c0_7 = arith.constant 0 : index
    %8 = vector.load %arg4[%c0_6, %c0_7] : memref<15x10xf32, #tpu.memory_space<vmem>>, vector<15x10xf32>
    %cst_8 = arith.constant dense<0.000000e+00> : vector<15x128xf32>
    %9 = tpu.matmul %8, %7, %cst_8 {dimension_numbers = #tpu.dot_dimension_numbers<[1], [0], [0], [1], [0, 0, 1, 1], [], []>} : vector<15x10xf32>, vector<10x128xf32>, vector<15x128xf32> -> vector<15x128xf32>
    %c0_9 = arith.constant 0 : index
    %c0_10 = arith.constant 0 : index
    %10 = vector.load %arg5[%c0_9, %c0_10] : memref<15x1xf32, #tpu.memory_space<vmem>>, vector<15x1xf32>
    %11 = vector.broadcast %10 : vector<15x1xf32> to vector<15x128xf32>
    %12 = arith.addf %9, %11 : vector<15x128xf32>
    %cst_11 = arith.constant 0.000000e+00 : f32
    %13 = vector.broadcast %cst_11 : f32 to vector<15x128xf32>
    %14 = arith.maximumf %12, %13 : vector<15x128xf32>
    %c0_12 = arith.constant 0 : index
    %c0_13 = arith.constant 0 : index
    %15 = vector.load %arg6[%c0_12, %c0_13] : memref<15x1xf32, #tpu.memory_space<vmem>>, vector<15x1xf32>
    %16 = vector.broadcast %15 : vector<15x1xf32> to vector<15x128xf32>
    %17 = arith.mulf %14, %16 : vector<15x128xf32>
    %cst_14 = arith.constant dense<0.000000e+00> : vector<128xf32>
    %18 = vector.multi_reduction <add>, %17, %cst_14 [0] : vector<15x128xf32> to vector<128xf32>
    %19 = vector.shape_cast %18 : vector<128xf32> to vector<1x128xf32>
    %c0_15 = arith.constant 0 : index
    %c0_16 = arith.constant 0 : index
    %20 = vector.load %arg7[%c0_15, %c0_16] : memref<1x1xf32, #tpu.memory_space<vmem>>, vector<1x1xf32>
    %21 = vector.broadcast %20 : vector<1x1xf32> to vector<1x128xf32>
    %22 = arith.addf %19, %21 : vector<1x128xf32>
    %c0_17 = arith.constant 0 : index
    %c0_18 = arith.constant 0 : index
    %23 = vector.load %arg8[%c0_17, %c0_18] : memref<1x128xf32, #tpu.memory_space<vmem>>, vector<1x128xf32>
    tpu.vector_store %arg8[%c0_17, %c0_18], %22 {strides = array<i32>} : memref<1x128xf32, #tpu.memory_space<vmem>>, vector<1x128xf32>,
    return
  }
  func.func @transform_0(%arg0: i32) -> (i32, i32) {
    %c0_i32 = arith.constant 0 : i32
    %c0_i32_0 = arith.constant 0 : i32
    return %c0_i32, %arg0 : i32, i32
  }
  func.func @transform_1(%arg0: i32) -> (i32, i32) {
    %c0_i32 = arith.constant 0 : i32
    %c0_i32_0 = arith.constant 0 : i32
    %c0_i32_1 = arith.constant 0 : i32
    return %c0_i32, %c0_i32_0 : i32, i32
  }
  func.func @transform_2(%arg0: i32) -> (i32, i32) {
    %c0_i32 = arith.constant 0 : i32
    %c0_i32_0 = arith.constant 0 : i32
    %c0_i32_1 = arith.constant 0 : i32
    return %c0_i32, %c0_i32_0 : i32, i32
  }
  func.func @transform_3(%arg0: i32) -> (i32, i32) {
    %c0_i32 = arith.constant 0 : i32
    %c0_i32_0 = arith.constant 0 : i32
    %c0_i32_1 = arith.constant 0 : i32
    return %c0_i32, %c0_i32_0 : i32, i32
  }
  func.func @transform_4(%arg0: i32) -> (i32, i32) {
    %c0_i32 = arith.constant 0 : i32
    %c0_i32_0 = arith.constant 0 : i32
    %c0_i32_1 = arith.constant 0 : i32
    return %c0_i32, %c0_i32_0 : i32, i32
  }
  func.func @transform_5(%arg0: i32) -> (i32, i32) {
    %c0_i32 = arith.constant 0 : i32
    %c0_i32_0 = arith.constant 0 : i32
    %c0_i32_1 = arith.constant 0 : i32
    return %c0_i32, %c0_i32_0 : i32, i32
  }
  func.func @transform_6(%arg0: i32) -> (i32, i32) {
    %c0_i32 = arith.constant 0 : i32
    %c0_i32_0 = arith.constant 0 : i32
    %c0_i32_1 = arith.constant 0 : i32
    return %c0_i32, %c0_i32_0 : i32, i32
  }
  func.func @transform_7(%arg0: i32) -> (i32, i32) {
    %c0_i32 = arith.constant 0 : i32
    %c0_i32_0 = arith.constant 0 : i32
    return %c0_i32, %arg0 : i32, i32
  }
}

</mosaic_0001>

<bundles_post_ra>
// kernel: tpu_custom_call.1
= control target key start
LH: loop header
LB: loop body
LE: loop exit
PB: predicated region body
PF: predicated region fallthrough
CT: control target
= control target key end

     0   :  { %s451_s0 = inlined_call_operand.vmem [shape: f32[13,128], index: 0, kind: input, shape index: {}]   ;;  %s452_s1 = inlined_call_operand.vmem [shape: f32[10,13], index: 1, kind: input, shape index: {}]   ;;  %s453_s2 = inlined_call_operand.vmem [shape: f32[10,1], index: 2, kind: input, shape index: {}]   ;;  %s454_s3 = inlined_call_operand.vmem [shape: f32[15,10], index: 3, kind: input, shape index: {}]   ;;  %s455_s4 = inlined_call_operand.vmem [shape: f32[15,1], index: 4, kind: input, shape index: {}]   ;;  %s456_s5 = inlined_call_operand.vmem [shape: f32[15,1], index: 5, kind: input, shape index: {}]   ;;  %s457_s6 = inlined_call_operand.<no memory space> [shape: f32[1,1], index: 6, kind: input, shape index: {}]   ;;  %s458_s7 = inlined_call_operand.hbm [shape: f32[1,128], index: 7, kind: output, shape index: {}]  }
   0x1   :  { %v12_v0 = vstv %s457_s6 }
   0x2   :  { %13 = vst [vmem:[#allocation2] sm:$0x1] %v12_v0 }
   0x3   :  { %v29_v1 = vld [vmem:[%s451_s0] sm:$0xff]  ;;  %v30_v2 = vld [vmem:[%s451_s0 + $0x8] sm:$0x1f]  ;;  %vm52_vm0 = vcmask 1044480   ;;  %vm353_vm1 = vmmov 1   ;;  %vm45_vm3 = vcmask 105472  }
   0x4   :  { %v31_v3 = vld [vmem:[%s452_s1] sm:$0xff]  ;;  %v312_v4 = vpack.c.bf16 %v30_v2, %v29_v1  ;;  %vm313_vm2 = vmpackc.low %vm52_vm0, %vm353_vm1  ;;  %v354_v6 = vmov 0  }
   0x5   :  { %v33_v5 = vld [vmem:[%s453_s2] sm:$0xff]  ;;  %302 = vmatprep.mubr.msk.f32.mxu0 %vm45_vm3, %v31_v3  ;;  %327 = vset.pattern.permute.xlu0 %v354_v6 }
   0x6   :  { %314 = vmatprep.subr.msk.bf16.mxu0 %vm313_vm2, %v312_v4  ;;  %37 = vperm.xlu0 %327, %v33_v5  }
   0x7   :  { %14 = vsyncpa [#allocation4], 0  ;;  %317 = vmatpush3.bf16.msk.msra.mxu0 %vm313_vm2, %v312_v4  ;;  %v32_v7 = vld [vmem:[%s452_s1 + $0x8] sm:$0x3]  ;;  %328 = vset.pattern.permute.xlu1 %v354_v6  ;;  %v133_v11 = vld [vmem:[%s454_s3] sm:$0xff]  ;;  %vm147_vm4 = vcmask 80896   ;;  %v264_v38 = vlaneseq }
   0x8   :  { %v34_v8 = vld [vmem:[%s453_s2 + $0x8] sm:$0x3]  ;;  %309 = vmatprep.mubr.msk.f32.mxu1 %vm147_vm4, %v133_v11  ;;  %v135_v13 = vld [vmem:[%s455_s4] sm:$0xff]  ;;  %vm154_vm5 = vcmask 1041408   ;;  %vm249_vm7 = vcmask 1046528  }
   0x9   :  { %v236_v9 = vld [vmem:[%s456_s5 + $0x8] sm:$0x7f]  ;;  %v258_v10 = vld [vmem:[#allocation2] sm:$0x1]  ;;  %vm319_vm6 = vmpackc.low %vm154_vm5, %vm353_vm1  ;;  %v265_v41 = vshrl.u32 %v264_v38, 7 }
   0xa   :  { %303 = vmatmul.mubr.msk.f32.vlgmr.msra.gmra.mrb[0].mxu0 %vm45_vm3, %v32_v7  ;;  %42 = vperm.xlu0 %327, %v34_v8   ;;  %v136_v12 = vld [vmem:[%s455_s4 + $0x8] sm:$0x7f]  ;;  %v235_v14 = vld [vmem:[%s456_s5] sm:$0xff] }
   0xb   :  { %144 = vperm.xlu1 %328, %v136_v12   ;;  %v134_v24 = vld [vmem:[%s454_s3 + $0x8] sm:$0x7f]  ;;  %v266_v44 = vsub.s32 0, %v265_v41  ;;  %s355_s3 = smov [#allocation3]  }
   0xc   :  { %s276_s5 = sshll.u32 %s355_s3, 4  ;;  %s277_s5 = int_to_ptr.vmem [resolvable:$true] %s276_s5 }
   0xd   :  { %s329_s22 = scalar_lea.vmem %s277_s5, 16  ;;  %s333_s23 = scalar_lea.vmem %s277_s5, 32 }
   0xe   :  { %244 = vperm.xlu0 %327, %v236_v9   ;;  %p330_p0 = scmp.ne.s32.totalorder %s277_s5, %s329_s22  ;;  %p334_p1 = scmp.lt.s32.totalorder %s277_s5, %s277_s5 }
   0xf   :  { %139 = vperm.xlu1 %328, %v135_v13   ;;  %p335_p2 = scmp.lt.s32.totalorder %s333_s23, %s329_s22 }
  0x11   :  { %p336_p3 = por %p335_p2, %p334_p1 }
  0x12   :  { %261 = vperm.xlu0 %327, %v258_v10  }
  0x13   :  { %239 = vperm.xlu1 %328, %v235_v14   ;;  %p337_p4 = pnand %p336_p3, %p330_p0 }
  0x85   :  { %v38_v15 = vpop.permute.xlu0 %37 }
  0x89   :  { %v43_v16 = vpop.permute.xlu0 %42 }
  0x8a   :  { %v145_v25 = vpop.permute.xlu1 %144 }
  0x8d   :  { %v245_v32 = vpop.permute.xlu0 %244 }
  0x8e   :  { %v140_v26 = vpop.permute.xlu1 %139 }
  0x91   :  { %v262_v46 = vpop.permute.xlu0 %261 }
  0x92   :  { %v240_v34 = vpop.permute.xlu1 %239  ;;  %v267_v48 = vrot.slane %v262_v46, %v266_v44 }
  0xdd   :  { %v304_v17 = vpop.f32.mrb[0].mxu0 }
  0xde   :  { %v128_v18 = vadd.f32 %v304_v17, %v43_v16  ;;  %v122_v19 = vpop.f32.mrb[1].mxu0 }
  0xdf   :  { %v123_v20 = vadd.f32 %v122_v19, %v38_v15 }
  0xe0   :  { %v132_v21 = vmax.f32 %v128_v18, 0.0 }
  0xe1   :  { %v131_v22 = vmax.f32 %v123_v20, 0.0 }
  0xe3   :  { %v318_v23 = vpack.c.bf16 %v132_v21, %v131_v22 }
  0xe5   :  { %320 = vmatprep.subr.msk.bf16.mxu1 %vm319_vm6, %v318_v23 }
  0xe6   :  { %323 = vmatpush3.bf16.msk.msra.mxu1 %vm319_vm6, %v318_v23 }
  0xe9   :  { %310 = vmatmul.mubr.msk.f32.vlgmr.msra.gmra.mrb[0].mxu1 %vm147_vm4, %v134_v24 }
 0x1bc   :  { %v311_v27 = vpop.f32.mrb[0].mxu1 }
 0x1bd   :  { %v230_v28 = vadd.f32 %v311_v27, %v145_v25  ;;  %v224_v29 = vpop.f32.mrb[1].mxu1 }
 0x1be   :  { %v225_v30 = vadd.f32 %v224_v29, %v140_v26 }
 0x1bf   :  { %v234_v31 = vmax.f32 %v230_v28, 0.0 }
 0x1c0   :  { %v233_v33 = vmax.f32 %v225_v30, 0.0 }
 0x1c1   :  { %v248_v35 = vmul.f32 %v245_v32, %v234_v31 }
 0x1c2   :  { %v247_v36 = vmul.f32 %v240_v34, %v233_v33 }
 0x1c3   :  { %v250_v37 = vsel %vm249_vm7, %v248_v35, 0.0 }
 0x1c4   :  { %v251_v39 = vadd.f32 %v250_v37, %v247_v36 }
 0x1c6   :  { %v252_v40 = vrot.slane %v251_v39, 4 }
 0x1c8   :  { %v253_v42 = vadd.f32 %v252_v40, %v251_v39 }
 0x1ca   :  { %v254_v43 = vrot.slane %v253_v42, 2 }
 0x1cc   :  { %v255_v45 = vadd.f32 %v254_v43, %v253_v42 }
 0x1ce   :  { %v256_v47 = vrot.slane %v255_v45, 1 }
 0x1d0   :  { %v257_v49 = vadd.f32 %v256_v47, %v255_v45 }
 0x1d2   :  { %v268_v50 = vadd.f32 %v267_v48, %v257_v49 }
 0x1d4   :  { %269 = vst [vmem:[#allocation3] sm:$0x1] %v268_v50 }
 0x1d5   :  { %340 = shalt.err (!%p337_p4)
}
 0x1d6   :  { %s341_s26 = scalar_lea.hbm %s458_s7, 16 }
 0x1d7   :  { %p342_p5 = scmp.ne.s32.totalorder %s458_s7, %s341_s26  ;;  %p345_p6 = scmp.lt.u32.totalorder %s341_s26, %s458_s7 }
 0x1d9   :  { %p347_p7 = pnand %p345_p6, %p342_p5 }
 0x1db   :  { %350 = shalt.err (!%p347_p7)
}
 0x1dc   :  { %279 = dma.vmem_to_hbm [thread:$0]  %s277_s5, 16, %s458_s7, [#allocation4]  }
 0x1dd   :  { %351 = dma.done.wait [#allocation4], 16  }
 0x1de   :  { %352 = vsyncadd [#allocation4], 4294967280 }
 0x1df   :  { %283 = vsyncpa [#allocation4], 1 }

</bundles_post_ra>
